<compile_context>
chip_gen: v6e
topology: v6e:2x2x1
jax: 0.10.0
libtpu: 0.0.40
codegen_flags: <defaults>
</compile_context>

<pallas_src>
import jax
import jax.numpy as jnp
from jax.experimental import pallas as pl
from jax.experimental.pallas import tpu as pltpu

LANE = 128        # lane width (minor dim of every tile)
ROW_GRAN = 16     # sublane granularity for block heights (covers f32 and bf16 packing)
TM_MAX = 4096     # max rows per grid step: 2 MiB f32 per input block
NUM_CHUNKS = 2    # leading "parallel" grid axis (sharded across TCs on megacore parts)


def _cdiv(a, b):
    return -(-a // b)


def _round_up(a, b):
    return _cdiv(a, b) * b


def _make_dice_kernel(tm, steps_per_chunk, n_valid):
    """Streaming global-dice reduction kernel.

    tm:              rows (sublanes) per grid step, multiple of ROW_GRAN.
    steps_per_chunk: inner-grid length per chunk (reduction axis).
    n_valid:         number of valid elements in the ORIGINAL flattened input.
    """
    tile_elems = tm * LANE
    full_steps = n_valid // tile_elems  # steps whose whole tile is valid data

    def kernel(x_ref, y_ref, out_ref, acc_pt, acc_den):
        c = pl.program_id(0)
        i = pl.program_id(1)
        last = pl.num_programs(1) - 1
        step = c * steps_per_chunk + i        # logical (unclamped) tile index

        @pl.when(i == 0)
        def _init():
            acc_pt[...] = jnp.zeros_like(acc_pt)
            acc_den[...] = jnp.zeros_like(acc_den)

        def _accumulate(masked):
            # Cast in-register; inputs may stream as bf16/fp16/int8/bool.
            x = x_ref[...].astype(jnp.float32)
            t = y_ref[...].astype(jnp.float32)
            # sigmoid(x) = 0.5*tanh(0.5*x) + 0.5 : single EUP op, no VALU divide.
            p = 0.5 * jnp.tanh(0.5 * x) + 0.5
            if masked:
                # Masks lane padding, Pallas partial-block garbage, and fully
                # out-of-range (clamped) steps.  Mask BEFORE the multiply so
                # garbage bits cannot turn into NaN * 0.
                valid = n_valid - step * tile_elems        # may be <= 0
                row = jax.lax.broadcasted_iota(jnp.int32, (tm, LANE), 0)
                col = jax.lax.broadcasted_iota(jnp.int32, (tm, LANE), 1)
                keep = (row * LANE + col) < valid
                p = jnp.where(keep, p, 0.0)
                t = jnp.where(keep, t, 0.0)
            # Fold the (tm, 128) tile into one (8, 128) vreg with pure
            # vreg-vreg VALU adds (no XLU), then a single accumulator
            # round-trip per grid step (instead of tm/8 load/add/stores).
            pt = (p * t).reshape(tm // 8, 8, LANE).sum(axis=0)
            den = (p + t).reshape(tm // 8, 8, LANE).sum(axis=0)
            acc_pt[...] += pt
            acc_den[...] += den

        is_full = step < full_steps

        @pl.when(is_full)
        def _full_tile():
            _accumulate(False)

        @pl.when(jnp.logical_not(is_full))
        def _ragged_tile():
            _accumulate(True)

        # Dump this chunk's partial sums as a lane-dense slab on its last step;
        # the tiny (NUM_CHUNKS*2*1024 element) final reduction is done in XLA.
        @pl.when(i == last)
        def _finalize():
            out_ref[0, 0] = acc_pt[...]
            out_ref[0, 1] = acc_den[...]

    return kernel


def binary_dice_loss(y_pred_logits, y_true, smooth=1e-05, eps=1e-07):
    """JAX/Pallas equivalent of BinaryDiceLoss.forward (global dice).

    The kernel is HBM-bandwidth bound: for best performance pass logits as
    bf16 and targets in their narrowest natural dtype (bool/int8/bf16) — the
    kernel promotes to f32 in-register, no wrapper-side cast is needed.
    """
    x = y_pred_logits.reshape(-1)
    y = y_true.reshape(-1)
    n = x.shape[0]

    # ---- tiling: balanced split across NUM_CHUNKS contiguous row-chunks ----
    m_rows = _cdiv(n, LANE)
    steps_per_chunk = _cdiv(_cdiv(m_rows, NUM_CHUNKS), TM_MAX)
    tm = min(TM_MAX,
             _round_up(_cdiv(m_rows, NUM_CHUNKS * steps_per_chunk), ROW_GRAN))

    # Lane/row alignment: for typical image tensors this is a free view (no
    # copy); only unaligned or tiny inputs pay one small pad, and the padded
    # elements are masked out inside the kernel anyway.
    m_rows_p = max(m_rows, tm)            # block must not be taller than the array
    n_target = m_rows_p * LANE
    if n_target != n:
        x = jnp.pad(x, (0, n_target - n))
        y = jnp.pad(y, (0, n_target - n))
    x2 = x.reshape(m_rows_p, LANE)
    y2 = y.reshape(m_rows_p, LANE)

    real_blocks = _cdiv(m_rows_p, tm)
    last_block = real_blocks - 1

    def in_map(c, i):
        # Clamp so duplicated "beyond the data" steps (fully masked in the
        # kernel) never issue an out-of-bounds DMA.
        return (jnp.minimum(c * steps_per_chunk + i, last_block), 0)

    kernel = _make_dice_kernel(tm, steps_per_chunk, n)

    bytes_in = int(x2.size * x2.dtype.itemsize + y2.size * y2.dtype.itemsize)
    cost = pl.CostEstimate(flops=8 * n, transcendentals=n,
                           bytes_accessed=bytes_in + NUM_CHUNKS * 2 * 8 * LANE * 4)

    parts = pl.pallas_call(
        kernel,
        out_shape=jax.ShapeDtypeStruct((NUM_CHUNKS, 2, 8, LANE), jnp.float32),
        grid_spec=pltpu.PrefetchScalarGridSpec(
            num_scalar_prefetch=0,
            grid=(NUM_CHUNKS, steps_per_chunk),
            in_specs=[
                pl.BlockSpec((tm, LANE), in_map),
                pl.BlockSpec((tm, LANE), in_map),
            ],
            out_specs=pl.BlockSpec((1, 2, 8, LANE), lambda c, i: (c, 0, 0, 0)),
            scratch_shapes=[
                pltpu.VMEM((8, LANE), jnp.float32),   # partial sum(p * t)
                pltpu.VMEM((8, LANE), jnp.float32),   # partial sum(p + t)
            ],
        ),
        compiler_params=pltpu.CompilerParams(
            dimension_semantics=("parallel", "arbitrary"),
            vmem_limit_bytes=32 * 1024 * 1024),
        cost_estimate=cost,
    )(x2, y2)

    intersection = jnp.sum(parts[:, 0])
    denom_sum = jnp.sum(parts[:, 1])                 # sum(p) + sum(t)
    denom = jnp.maximum(denom_sum + smooth, eps)     # .clamp_min(eps)
    dsc = (2.0 * intersection + smooth) / denom
    return 1.0 - dsc     # .mean() of a scalar is the scalar itself


def _reference_loss(y_pred_logits, y_true, smooth=1e-05, eps=1e-07):
    p = jax.nn.sigmoid(y_pred_logits.astype(jnp.float32))
    t = y_true.astype(jnp.float32)
    inter = jnp.sum(p * t)
    denom = jnp.maximum(jnp.sum(p) + jnp.sum(t) + smooth, eps)
    return 1.0 - (2.0 * inter + smooth) / denom


if __name__ == "__main__":
    key = jax.random.PRNGKey(0)
    k1, k2, k3, k4 = jax.random.split(key, 4)

    # Test 1: lane/row-aligned NCHW input -> no pad; exercises the full-tile
    # path (chunk 0) and the clamped fully-masked path (chunk 1).
    B, C, H, W = 2, 4, 16, 16
    logits = jax.random.normal(k1, (B, C, H, W), dtype=jnp.float32)
    targets = (jax.random.uniform(k2, (B, C, H, W)) > 0.5).astype(jnp.float32)
    loss = jax.block_until_ready(binary_dice_loss(logits, targets))
    ref = _reference_loss(logits, targets)
    assert jnp.allclose(loss, ref, atol=1e-5, rtol=1e-5), (loss, ref)

    # Test 2: ragged shape + bf16 logits -> exercises padding, the in-kernel
    # mask, and in-register dtype promotion (no wrapper-side astype).
    B2, C2, H2, W2 = 2, 3, 15, 17
    logits2 = jax.random.normal(k3, (B2, C2, H2, W2),
                                dtype=jnp.float32).astype(jnp.bfloat16)
    targets2 = (jax.random.uniform(k4, (B2, C2, H2, W2)) > 0.5).astype(jnp.float32)
    loss2 = jax.block_until_ready(binary_dice_loss(logits2, targets2))
    ref2 = _reference_loss(logits2, targets2)
    assert jnp.allclose(loss2, ref2, atol=1e-5, rtol=1e-5), (loss2, ref2)

    print("KERNEL_OK")
</pallas_src>

<mosaic_0001>
module attributes {stable_mosaic.version = 11 : i64} {
  func.func @kernel(%arg0: i32, %arg1: i32, %arg2: memref<16x128xf32, #tpu.memory_space<vmem>>, %arg3: memref<16x128xf32, #tpu.memory_space<vmem>>, %arg4: memref<1x2x8x128xf32, #tpu.memory_space<vmem>>, %arg5: memref<8x128xf32, #tpu.memory_space<vmem>>, %arg6: memref<8x128xf32, #tpu.memory_space<vmem>>) attributes {dimension_semantics = [#tpu.dimension_semantics<parallel>, #tpu.dimension_semantics<arbitrary>], iteration_bounds = array<i64: 2, 1>, scalar_prefetch = 0 : i64, scratch_operands = 2 : i64, tpu.core_type = #tpu.core_type<tc>, window_params = [{transform_indices = @transform_0, window_bounds = array<i64: 16, 128>}, {transform_indices = @transform_1, window_bounds = array<i64: 16, 128>}, {transform_indices = @transform_2, window_bounds = array<i64: 1, 2, 8, 128>}]} {
    %c1_i32 = arith.constant 1 : i32
    %0 = arith.muli %arg0, %c1_i32 : i32
    %1 = arith.addi %0, %arg1 : i32
    %c0_i32 = arith.constant 0 : i32
    %2 = arith.cmpi eq, %arg1, %c0_i32 : i32
    %3 = arith.extui %2 : i1 to i32
    %c0_i32_0 = arith.constant 0 : i32
    %4 = arith.cmpi ne, %3, %c0_i32_0 : i32
    scf.if %4 {
      %cst = arith.constant 0.000000e+00 : f32
      %14 = vector.broadcast %cst : f32 to vector<8x128xf32>
      %c0 = arith.constant 0 : index
      %c0_6 = arith.constant 0 : index
      %15 = vector.load %arg5[%c0, %c0_6] : memref<8x128xf32, #tpu.memory_space<vmem>>, vector<8x128xf32>
      tpu.vector_store %arg5[%c0, %c0_6], %14 {strides = array<i32>} : memref<8x128xf32, #tpu.memory_space<vmem>>, vector<8x128xf32>,
      %cst_7 = arith.constant 0.000000e+00 : f32
      %16 = vector.broadcast %cst_7 : f32 to vector<8x128xf32>
      %c0_8 = arith.constant 0 : index
      %c0_9 = arith.constant 0 : index
      %17 = vector.load %arg6[%c0_8, %c0_9] : memref<8x128xf32, #tpu.memory_space<vmem>>, vector<8x128xf32>
      tpu.vector_store %arg6[%c0_8, %c0_9], %16 {strides = array<i32>} : memref<8x128xf32, #tpu.memory_space<vmem>>, vector<8x128xf32>,
    } else {
    }
    %c1_i32_1 = arith.constant 1 : i32
    %5 = arith.cmpi slt, %1, %c1_i32_1 : i32
    %6 = arith.extui %5 : i1 to i32
    %c0_i32_2 = arith.constant 0 : i32
    %7 = arith.cmpi ne, %6, %c0_i32_2 : i32
    scf.if %7 {
      %c0 = arith.constant 0 : index
      %c0_6 = arith.constant 0 : index
      %14 = vector.load %arg2[%c0, %c0_6] : memref<16x128xf32, #tpu.memory_space<vmem>>, vector<16x128xf32>
      %c0_7 = arith.constant 0 : index
      %c0_8 = arith.constant 0 : index
      %15 = vector.load %arg3[%c0_7, %c0_8] : memref<16x128xf32, #tpu.memory_space<vmem>>, vector<16x128xf32>
      %cst = arith.constant 5.000000e-01 : f32
      %16 = vector.broadcast %cst : f32 to vector<16x128xf32>
      %17 = arith.mulf %16, %14 : vector<16x128xf32>
      %18 = math.tanh %17 : vector<16x128xf32>
      %cst_9 = arith.constant 5.000000e-01 : f32
      %19 = vector.broadcast %cst_9 : f32 to vector<16x128xf32>
      %20 = arith.mulf %19, %18 : vector<16x128xf32>
      %cst_10 = arith.constant 5.000000e-01 : f32
      %21 = vector.broadcast %cst_10 : f32 to vector<16x128xf32>
      %22 = arith.addf %20, %21 : vector<16x128xf32>
      %23 = arith.mulf %22, %15 : vector<16x128xf32>
      %24 = vector.shape_cast %23 : vector<16x128xf32> to vector<2x8x128xf32>
      %cst_11 = arith.constant dense<0.000000e+00> : vector<8x128xf32>
      %25 = vector.multi_reduction <add>, %24, %cst_11 [0] : vector<2x8x128xf32> to vector<8x128xf32>
      %26 = arith.addf %22, %15 : vector<16x128xf32>
      %27 = vector.shape_cast %26 : vector<16x128xf32> to vector<2x8x128xf32>
      %cst_12 = arith.constant dense<0.000000e+00> : vector<8x128xf32>
      %28 = vector.multi_reduction <add>, %27, %cst_12 [0] : vector<2x8x128xf32> to vector<8x128xf32>
      %c0_13 = arith.constant 0 : index
      %c0_14 = arith.constant 0 : index
      %29 = vector.load %arg5[%c0_13, %c0_14] : memref<8x128xf32, #tpu.memory_space<vmem>>, vector<8x128xf32>
      %30 = arith.addf %29, %25 : vector<8x128xf32>
      %c0_15 = arith.constant 0 : index
      %c0_16 = arith.constant 0 : index
      %31 = vector.load %arg5[%c0_15, %c0_16] : memref<8x128xf32, #tpu.memory_space<vmem>>, vector<8x128xf32>
      tpu.vector_store %arg5[%c0_15, %c0_16], %30 {strides = array<i32>} : memref<8x128xf32, #tpu.memory_space<vmem>>, vector<8x128xf32>,
      %c0_17 = arith.constant 0 : index
      %c0_18 = arith.constant 0 : index
      %32 = vector.load %arg6[%c0_17, %c0_18] : memref<8x128xf32, #tpu.memory_space<vmem>>, vector<8x128xf32>
      %33 = arith.addf %32, %28 : vector<8x128xf32>
      %c0_19 = arith.constant 0 : index
      %c0_20 = arith.constant 0 : index
      %34 = vector.load %arg6[%c0_19, %c0_20] : memref<8x128xf32, #tpu.memory_space<vmem>>, vector<8x128xf32>
      tpu.vector_store %arg6[%c0_19, %c0_20], %33 {strides = array<i32>} : memref<8x128xf32, #tpu.memory_space<vmem>>, vector<8x128xf32>,
    } else {
    }
    %true = arith.constant true
    %8 = arith.xori %5, %true : i1
    %9 = arith.extui %8 : i1 to i32
    %c0_i32_3 = arith.constant 0 : i32
    %10 = arith.cmpi ne, %9, %c0_i32_3 : i32
    scf.if %10 {
      %c0 = arith.constant 0 : index
      %c0_6 = arith.constant 0 : index
      %14 = vector.load %arg2[%c0, %c0_6] : memref<16x128xf32, #tpu.memory_space<vmem>>, vector<16x128xf32>
      %c0_7 = arith.constant 0 : index
      %c0_8 = arith.constant 0 : index
      %15 = vector.load %arg3[%c0_7, %c0_8] : memref<16x128xf32, #tpu.memory_space<vmem>>, vector<16x128xf32>
      %cst = arith.constant 5.000000e-01 : f32
      %16 = vector.broadcast %cst : f32 to vector<16x128xf32>
      %17 = arith.mulf %16, %14 : vector<16x128xf32>
      %18 = math.tanh %17 : vector<16x128xf32>
      %cst_9 = arith.constant 5.000000e-01 : f32
      %19 = vector.broadcast %cst_9 : f32 to vector<16x128xf32>
      %20 = arith.mulf %19, %18 : vector<16x128xf32>
      %cst_10 = arith.constant 5.000000e-01 : f32
      %21 = vector.broadcast %cst_10 : f32 to vector<16x128xf32>
      %22 = arith.addf %20, %21 : vector<16x128xf32>
      %c2048_i32 = arith.constant 2048 : i32
      %23 = arith.muli %1, %c2048_i32 : i32
      %c2048_i32_11 = arith.constant 2048 : i32
      %24 = arith.subi %c2048_i32_11, %23 : i32
      %25 = tpu.iota {dimensions = array<i32: 0>} : vector<16x128xi32>
      %26 = tpu.iota {dimensions = array<i32: 1>} : vector<16x128xi32>
      %c128_i32 = arith.constant 128 : i32
      %27 = vector.broadcast %c128_i32 : i32 to vector<16x128xi32>
      %28 = arith.muli %25, %27 : vector<16x128xi32>
      %29 = arith.addi %28, %26 : vector<16x128xi32>
      %30 = vector.broadcast %24 : i32 to vector<16x128xi32>
      %31 = arith.cmpi slt, %29, %30 : vector<16x128xi32>
      %cst_12 = arith.constant 0.000000e+00 : f32
      %32 = vector.broadcast %cst_12 : f32 to vector<16x128xf32>
      %33 = arith.select %31, %22, %32 : vector<16x128xi1>, vector<16x128xf32>
      %cst_13 = arith.constant 0.000000e+00 : f32
      %34 = vector.broadcast %cst_13 : f32 to vector<16x128xf32>
      %35 = arith.select %31, %15, %34 : vector<16x128xi1>, vector<16x128xf32>
      %36 = arith.mulf %33, %35 : vector<16x128xf32>
      %37 = vector.shape_cast %36 : vector<16x128xf32> to vector<2x8x128xf32>
      %cst_14 = arith.constant dense<0.000000e+00> : vector<8x128xf32>
      %38 = vector.multi_reduction <add>, %37, %cst_14 [0] : vector<2x8x128xf32> to vector<8x128xf32>
      %39 = arith.addf %33, %35 : vector<16x128xf32>
      %40 = vector.shape_cast %39 : vector<16x128xf32> to vector<2x8x128xf32>
      %cst_15 = arith.constant dense<0.000000e+00> : vector<8x128xf32>
      %41 = vector.multi_reduction <add>, %40, %cst_15 [0] : vector<2x8x128xf32> to vector<8x128xf32>
      %c0_16 = arith.constant 0 : index
      %c0_17 = arith.constant 0 : index
      %42 = vector.load %arg5[%c0_16, %c0_17] : memref<8x128xf32, #tpu.memory_space<vmem>>, vector<8x128xf32>
      %43 = arith.addf %42, %38 : vector<8x128xf32>
      %c0_18 = arith.constant 0 : index
      %c0_19 = arith.constant 0 : index
      %44 = vector.load %arg5[%c0_18, %c0_19] : memref<8x128xf32, #tpu.memory_space<vmem>>, vector<8x128xf32>
      tpu.vector_store %arg5[%c0_18, %c0_19], %43 {strides = array<i32>} : memref<8x128xf32, #tpu.memory_space<vmem>>, vector<8x128xf32>,
      %c0_20 = arith.constant 0 : index
      %c0_21 = arith.constant 0 : index
      %45 = vector.load %arg6[%c0_20, %c0_21] : memref<8x128xf32, #tpu.memory_space<vmem>>, vector<8x128xf32>
      %46 = arith.addf %45, %41 : vector<8x128xf32>
      %c0_22 = arith.constant 0 : index
      %c0_23 = arith.constant 0 : index
      %47 = vector.load %arg6[%c0_22, %c0_23] : memref<8x128xf32, #tpu.memory_space<vmem>>, vector<8x128xf32>
      tpu.vector_store %arg6[%c0_22, %c0_23], %46 {strides = array<i32>} : memref<8x128xf32, #tpu.memory_space<vmem>>, vector<8x128xf32>,
    } else {
    }
    %c0_i32_4 = arith.constant 0 : i32
    %11 = arith.cmpi eq, %arg1, %c0_i32_4 : i32
    %12 = arith.extui %11 : i1 to i32
    %c0_i32_5 = arith.constant 0 : i32
    %13 = arith.cmpi ne, %12, %c0_i32_5 : i32
    scf.if %13 {
      %c0 = arith.constant 0 : index
      %c0_6 = arith.constant 0 : index
      %14 = vector.load %arg5[%c0, %c0_6] : memref<8x128xf32, #tpu.memory_space<vmem>>, vector<8x128xf32>
      %c0_7 = arith.constant 0 : index
      %c0_8 = arith.constant 0 : index
      %c0_9 = arith.constant 0 : index
      %c0_10 = arith.constant 0 : index
      %15 = vector.load %arg4[%c0_7, %c0_8, %c0_9, %c0_10] : memref<1x2x8x128xf32, #tpu.memory_space<vmem>>, vector<1x1x8x128xf32>
      %16 = vector.shape_cast %15 : vector<1x1x8x128xf32> to vector<8x128xf32>
      %17 = vector.shape_cast %14 : vector<8x128xf32> to vector<1x1x8x128xf32>
      tpu.vector_store %arg4[%c0_7, %c0_8, %c0_9, %c0_10], %17 {strides = array<i32>} : memref<1x2x8x128xf32, #tpu.memory_space<vmem>>, vector<1x1x8x128xf32>,
      %c0_11 = arith.constant 0 : index
      %c0_12 = arith.constant 0 : index
      %18 = vector.load %arg6[%c0_11, %c0_12] : memref<8x128xf32, #tpu.memory_space<vmem>>, vector<8x128xf32>
      %c0_13 = arith.constant 0 : index
      %c1 = arith.constant 1 : index
      %c0_14 = arith.constant 0 : index
      %c0_15 = arith.constant 0 : index
      %19 = vector.load %arg4[%c0_13, %c1, %c0_14, %c0_15] : memref<1x2x8x128xf32, #tpu.memory_space<vmem>>, vector<1x1x8x128xf32>
      %20 = vector.shape_cast %19 : vector<1x1x8x128xf32> to vector<8x128xf32>
      %21 = vector.shape_cast %18 : vector<8x128xf32> to vector<1x1x8x128xf32>
      tpu.vector_store %arg4[%c0_13, %c1, %c0_14, %c0_15], %21 {strides = array<i32>} : memref<1x2x8x128xf32, #tpu.memory_space<vmem>>, vector<1x1x8x128xf32>,
    } else {
    }
    return
  }
  func.func @transform_0(%arg0: i32, %arg1: i32) -> (i32, i32) {
    %c1_i32 = arith.constant 1 : i32
    %0 = arith.muli %arg0, %c1_i32 : i32
    %1 = arith.addi %0, %arg1 : i32
    %c0_i32 = arith.constant 0 : i32
    %2 = arith.minsi %1, %c0_i32 : i32
    %c0_i32_0 = arith.constant 0 : i32
    %c0_i32_1 = arith.constant 0 : i32
    return %2, %c0_i32_0 : i32, i32
  }
  func.func @transform_1(%arg0: i32, %arg1: i32) -> (i32, i32) {
    %c1_i32 = arith.constant 1 : i32
    %0 = arith.muli %arg0, %c1_i32 : i32
    %1 = arith.addi %0, %arg1 : i32
    %c0_i32 = arith.constant 0 : i32
    %2 = arith.minsi %1, %c0_i32 : i32
    %c0_i32_0 = arith.constant 0 : i32
    %c0_i32_1 = arith.constant 0 : i32
    return %2, %c0_i32_0 : i32, i32
  }
  func.func @transform_2(%arg0: i32, %arg1: i32) -> (i32, i32, i32, i32) {
    %c0_i32 = arith.constant 0 : i32
    %c0_i32_0 = arith.constant 0 : i32
    %c0_i32_1 = arith.constant 0 : i32
    %c0_i32_2 = arith.constant 0 : i32
    return %arg0, %c0_i32, %c0_i32_0, %c0_i32_1 : i32, i32, i32, i32
  }
}

</mosaic_0001>

<bundles_post_ra>
// kernel: tpu_custom_call.1
= control target key start
LH: loop header
LB: loop body
LE: loop exit
PB: predicated region body
PF: predicated region fallthrough
CT: control target
= control target key end

     0   :  { %7 = vsyncpa [#allocation5], 0  ;;  %s980_s0 = inlined_call_operand.hbm [shape: f32[16,128], index: 0, kind: input, shape index: {}]   ;;  %s981_s1 = inlined_call_operand.hbm [shape: f32[16,128], index: 1, kind: input, shape index: {}]   ;;  %s982_s2 = inlined_call_operand.hbm [shape: f32[2,2,8,128], index: 2, kind: output, shape index: {}]  }
   0x1   :  { %9 = vsyncpa [#allocation5 + $0x1], 0 }
   0x2   :  { %10 = vsyncpa [#allocation8], 0 }
   0x3   :  { %12 = vsyncpa [#allocation8 + $0x1], 0 }
   0x4   :  { %13 = vsyncpa [#allocation6], 0 }
   0x5   :  { %15 = vsyncpa [#allocation6 + $0x1], 0  ;;  %s763_s9 = smov 0   ;;  %s765_s10 = smov 0  }
   0x6   :  { %s767_s11 = smov 0   ;;  %s769_s12 = smov 0  }
   0x7   :  { %s771_s13 = smov 0   ;;  %s773_s14 = smov 0  }
   0x8   :  { %s775_s15 = smov 0   ;;  %s777_s16 = smov 0  }
   0x9 LB: > { %s447_s17 = sadd.s32 4294967295, %s738_s16   ;;  %s448_s18 = sadd.s32 4294967294, %s738_s16   ;;  %s738_s16 = sphi %s777_s16, %s21_s16   ;;  %s734_s15 = sphi %s775_s15, %s1001_s15   ;;  %s730_s14 = sphi %s773_s14, %s1000_s14   ;;  %s726_s13 = sphi %s771_s13, %s970_s13   ;;  %s722_s12 = sphi %s769_s12, %s999_s12   ;;  %s718_s11 = sphi %s767_s11, %s998_s11   ;;  %s714_s10 = sphi %s765_s10, %s997_s10   ;;  %s710_s9 = sphi %s763_s9, %s996_s9  }
   0xa   : > { %s33_s19 = sadd.s32 1, %s734_s15  ;;  %p707_p1 = scmp.ne.s32.totalorder %s726_s13, 0 }
   0xb   : > { %p35_p0 = scmp.ge.s32.totalorder %s33_s19, 2  ;;  %p54_p2 = scmp.eq.s32.totalorder %s738_s16, 0 }
   0xc   : > { %p59_p3 = scmp.ne.s32.totalorder %s726_s13, %s722_s12  ;;  %p60_p5 = scmp.eq.s32.totalorder %s447_s17, 0 }
   0xd   : > { %s1003_s19 = smov (%p35_p0, %s33_s19), 0  ;;  %p809_p4 = por %p707_p1, %p54_p2 }
   0xe   : > { %p813_p6 = por %p60_p5, %p59_p3  ;;  %s101_s22 = ssub.s32 %s734_s15, %s1003_s19 }
   0xf   : > { %p102_p7 = scmp.eq.s32.totalorder %s101_s22, 0  ;;  %s104_s23 = sadd.s32 1, %s718_s11 }
  0x10   : > { %s986_s21 = scalar_select %p813_p6, 1, 0 }
  0x11   : > { %s821_s24 = scalar_select %p102_p7, %s718_s11, %s104_s23  }
  0x12   : > { %p114_p8 = scmp.ne.s32.totalorder %s718_s11, %s714_s10  ;;  %p115_p9 = scmp.eq.s32.totalorder %s447_s17, 1 }
  0x13   : > { %p120_p10 = scmp.ne.s32.totalorder %s714_s10, %s710_s9  ;;  %p121_p11 = scmp.eq.s32.totalorder %s448_s18, 1 }
  0x14   : > { %p827_p12 = por %p115_p9, %p114_p8  ;;  %p490_p1 = scmp.lt.s32.totalorder %s738_s16, 2 }
  0x15   : > { %p832_p0 = por %p121_p11, %p120_p10  ;;  %s740_s27 = smov [#allocation4]  }
  0x16   : > { %s987_s25 = scalar_select %p827_p12, 1, 0 }
  0x17   : > { %s988_s26 = scalar_select %p832_p0, 1, 0 }
  0x18   : > { %s155_s28 = sshll.u32 %s740_s27, 4  ;;  %p839_p2 = pnand %p490_p1, %p809_p4  ;;  %s156_s28 = int_to_ptr.vmem [resolvable:$true] %s155_s28 }
  0x19   : > { %s577_s4 = scalar_lea.hbm %s980_s0, 256 }
  0x1a   : > { %p578_p3 = scmp.ne.s32.totalorder %s980_s0, %s577_s4  ;;  %p579_p5 = pneg %p839_p2 }
  0x1b   : > { %p584_p8 = scmp.lt.s32.totalorder %s577_s4, %s577_s4 }
  0x1c   : > { %p580_p7 = pnand %p579_p5, %p578_p3 }
  0x1e   : > { %p581_p4 = pneg %p580_p7 }
  0x20   : > { %p586_p9 = pnand %p584_p8, %p581_p4 }
  0x22   : > { %589 = shalt.err (!%p586_p9)
}
  0x23   : > { %s590_s7 = scalar_lea.vmem %s156_s28, 256  ;;  %s597_s8 = scalar_lea.vmem %s156_s28, 512 }
  0x24   : > { %p591_p10 = scmp.ne.s32.totalorder %s156_s28, %s590_s7  ;;  %p598_p13 = scmp.lt.s32.totalorder %s156_s28, %s156_s28 }
  0x25   : > { %p599_p0 = scmp.lt.s32.totalorder %s597_s8, %s590_s7 }
  0x26   : > { %p593_p11 = pnand %p591_p10, %p579_p5 }
  0x27   : > { %p600_p12 = por %p599_p0, %p598_p13 }
  0x28   : > { %p594_p1 = pneg %p593_p11 }
  0x2a   : > { %p601_p6 = pnand %p600_p12, %p594_p1 }
  0x2c   : > { %604 = shalt.err (!%p601_p6)
}
  0x2d   : > { %s741_s12 = smov 128   ;;  %s742_s17 = smov 8  }
  0x2e   : > { %482 = dma.hbm_to_vmem [thread:$0]  (!%p839_p2), %s980_s0, 256, %s156_s28, [#allocation5], %s741_s12, %s741_s12, %s742_s17  }
  0x2f   : > { %p457_p3 = scmp.ge.s32.totalorder %s738_s16, 1  ;;  %p187_p7 = scmp.lt.s32.totalorder %s738_s16, 3 }
  0x30   : > { %s743_s23 = smov [#allocation7]   ;;  %s605_s4 = scalar_lea.hbm %s981_s1, 256 }
  0x31   : > { %p864_p4 = pnand %p457_p3, %p187_p7  ;;  %s179_s27 = sshll.u32 %s743_s23, 4  ;;  %s180_s27 = int_to_ptr.vmem [resolvable:$true] %s179_s27 }
  0x32   : > { %p606_p6 = scmp.ne.s32.totalorder %s981_s1, %s605_s4  ;;  %p612_p0 = scmp.lt.s32.totalorder %s605_s4, %s605_s4 }
  0x33   : > { %s990_s22 = scalar_select %p864_p4, 1, 0 }
  0x34   : > { %p608_p12 = pnand %p606_p6, %p579_p5 }
  0x36   : > { %p609_p13 = pneg %p608_p12 }
  0x38   : > { %p614_p8 = pnand %p612_p0, %p609_p13 }
  0x3a   : > { %617 = shalt.err (!%p614_p8)
}
  0x3b   : > { %s618_s28 = scalar_lea.vmem %s180_s27, 256  ;;  %s625_s7 = scalar_lea.vmem %s180_s27, 512 }
  0x3c   : > { %p619_p9 = scmp.ne.s32.totalorder %s180_s27, %s618_s28  ;;  %p626_p1 = scmp.lt.s32.totalorder %s180_s27, %s180_s27 }
  0x3d   : > { %p627_p3 = scmp.lt.s32.totalorder %s625_s7, %s618_s28 }
  0x3e   : > { %p621_p10 = pnand %p619_p9, %p579_p5 }
  0x3f   : > { %p628_p7 = por %p627_p3, %p626_p1 }
  0x40   : > { %p622_p11 = pneg %p621_p10 }
  0x42   : > { %p629_p4 = pnand %p628_p7, %p622_p11 }
  0x44   : > { %632 = shalt.err (!%p629_p4)
}
  0x45   : > { %485 = dma.hbm_to_vmem [thread:$0]  (!%p839_p2), %s981_s1, 256, %s180_s27, [#allocation8], %s741_s12, %s741_s12, %s742_s17  }
  0x46   : > { %p991_p6 = scmp.ne.s32.totalorder %s990_s22, 0 }
  0x47   : > { %s193_s20 = sand.u32 (!%p991_p6), 1, %s726_s13   ;;  %p992_p5 = scmp.ne.s32.totalorder (!%p991_p6), %s986_s21, 0 }
  0x48   : > { %191 = sbr.rel (%p991_p6) target bundleno = 178 (0xb2), region = 28  ;;  %s458_s23 = sshll.u32 (!%p991_p6), %s193_s20, 4 }
  0x49   : > { %s194_s30 = scalar_lea.sflag (!%p991_p6), [#allocation5], %s193_s20  ;;  %s888_s3 = scalar_lea.vmem (!%p991_p6), [#allocation4], %s458_s23 }
  0x4d   : > { %696 = dma.done.wait (%p992_p5), %s194_s30, 256  }
  0x4e   : > { %698 = vsyncadd (%p992_p5), %s194_s30, 4294967040  ;;  %s203_s29 = scalar_lea.sflag [#allocation8], %s193_s20  ;;  %s894_s4 = scalar_lea.vmem [#allocation7], %s458_s23 }
  0x4f   : > { %700 = dma.done.wait (%p992_p5), %s203_s29, 256  }
  0x50   : > { %702 = vsyncadd (%p992_p5), %s203_s29, 4294967040  ;;  %s229_s12 = sand.u32 1, %s714_s10   ;;  %v744_v0 = vmov 0.0   ;;  %p461_p2 = scmp.ge.s32.totalorder %s730_s14, 1 }
  0x51   : > { %s460_s17 = sshll.u32 %s229_s12, 4  ;;  %245 = vst [vmem:[#allocation2] sm:$0xff] %v744_v0  ;;  %246 = vst [vmem:[#allocation3] sm:$0xff] %v744_v0 }
  0x52   : > { %s903_s22 = scalar_lea.vmem [#allocation9], %s460_s17  ;;  %250 = sbr.rel (%p461_p2) target bundleno = 116 (0x74), region = 44 }
  0x57   : > { %v251_v1 = vld [vmem:[%s888_s3] sm:$0xff]  ;;  %v252_v2 = vld [vmem:[%s888_s3 + $0x8] sm:$0xff] }
  0x58   : > { %v255_v3 = vmul.f32 0.5, %v251_v1  ;;  %v256_v4 = vmul.f32 0.5, %v252_v2  ;;  %v253_v8 = vld [vmem:[%s894_s4] sm:$0xff]  ;;  %v254_v10 = vld [vmem:[%s894_s4 + $0x8] sm:$0xff] }
  0x59   : > { %v269_v17 = vld [vmem:[#allocation2] sm:$0xff]  ;;  %v272_v18 = vld [vmem:[#allocation3] sm:$0xff] }
  0x5a   : > { %569 = vtanh.f32 %v255_v3 }
  0x5b   : > { %571 = vtanh.f32 %v256_v4 }
  0x67   : > { %v570_v5 = vpop.eup %569 }
  0x68   : > { %v572_v6 = vpop.eup %571  ;;  %v259_v7 = vmul.f32 0.5, %v570_v5 }
  0x69   : > { %v260_v9 = vmul.f32 0.5, %v572_v6 }
  0x6a   : > { %v261_v11 = vadd.f32 0.5, %v259_v7 }
  0x6b   : > { %v262_v12 = vadd.f32 0.5, %v260_v9 }
  0x6c   : > { %v263_v13 = vmul.f32 %v261_v11, %v253_v8  ;;  %v266_v14 = vadd.f32 %v261_v11, %v253_v8 }
  0x6d   : > { %v264_v15 = vmul.f32 %v262_v12, %v254_v10  ;;  %v267_v16 = vadd.f32 %v262_v12, %v254_v10 }
  0x6f   : > { %v265_v19 = vadd.f32 %v264_v15, %v263_v13  ;;  %v268_v20 = vadd.f32 %v267_v16, %v266_v14 }
  0x71   : > { %v270_v21 = vadd.f32 %v269_v17, %v265_v19  ;;  %v273_v22 = vadd.f32 %v272_v18, %v268_v20 }
  0x73   : > { %271 = vst [vmem:[#allocation2] sm:$0xff] %v270_v21  ;;  %274 = vst [vmem:[#allocation3] sm:$0xff] %v273_v22 }
  0x74 PF: > { %p462_p4 = scmp.lt.s32.totalorder %s730_s14, 1 }
  0x75   : > { %s463_s21 = sshll.u32 (!%p462_p4), %s730_s14, 11 }
  0x76   : > { %278 = sbr.rel (%p462_p4) target bundleno = 153 (0x99), region = 48  ;;  %s292_s27 = ssub.s32 (!%p462_p4), 2048, %s463_s21 }
  0x7b   : > { %v279_v23 = vld [vmem:[%s888_s3] sm:$0xff]  ;;  %v280_v24 = vld [vmem:[%s888_s3 + $0x8] sm:$0xff]  ;;  %v293_v25 = vlaneseq  ;;  %v302_v35 = vstv %s292_s27 }
  0x7c   : > { %v283_v26 = vmul.f32 0.5, %v279_v23  ;;  %v284_v27 = vmul.f32 0.5, %v280_v24  ;;  %v281_v37 = vld [vmem:[%s894_s4] sm:$0xff]  ;;  %v282_v39 = vld [vmem:[%s894_s4 + $0x8] sm:$0xff] }
  0x7d   : > { %v294_v28 = vshrl.u32 %v293_v25, 7  ;;  %v297_v30 = vand.u32 127, %v293_v25  ;;  %v315_v52 = vld [vmem:[#allocation2] sm:$0xff]  ;;  %v318_v53 = vld [vmem:[#allocation3] sm:$0xff] }
  0x7e   : > { %573 = vtanh.f32 %v283_v26 }
  0x7f   : > { %575 = vtanh.f32 %v284_v27  ;;  %v295_v29 = vadd.s32 8, %v294_v28  ;;  %v298_v31 = vmul.u32 128, %v294_v28 }
  0x81   : > { %v299_v32 = vmul.u32 128, %v295_v29  ;;  %v300_v33 = vadd.s32 %v298_v31, %v297_v30 }
  0x83   : > { %v301_v34 = vadd.s32 %v299_v32, %v297_v30  ;;  %vm303_vm0 = vcmp.lt.s32.totalorder %v300_v33, %v302_v35 }
  0x84   : > { %v307_v43 = vsel %vm303_vm0, %v281_v37, 0.0 }
  0x85   : > { %vm304_vm1 = vcmp.lt.s32.totalorder %v301_v34, %v302_v35 }
  0x86   : > { %v308_v45 = vsel %vm304_vm1, %v282_v39, 0.0 }
  0x8b   : > { %v574_v36 = vpop.eup %573 }
  0x8c   : > { %v576_v38 = vpop.eup %575  ;;  %v287_v40 = vmul.f32 0.5, %v574_v36 }
  0x8d   : > { %v288_v41 = vmul.f32 0.5, %v576_v38 }
  0x8e   : > { %v289_v42 = vadd.f32 0.5, %v287_v40 }
  0x8f   : > { %v290_v44 = vadd.f32 0.5, %v288_v41 }
  0x90   : > { %v305_v46 = vsel %vm303_vm0, %v289_v42, 0.0 }
  0x91   : > { %v306_v47 = vsel %vm304_vm1, %v290_v44, 0.0  ;;  %v309_v48 = vmul.f32 %v307_v43, %v305_v46  ;;  %v312_v49 = vadd.f32 %v307_v43, %v305_v46 }
  0x92   : > { %v310_v50 = vmul.f32 %v308_v45, %v306_v47  ;;  %v313_v51 = vadd.f32 %v308_v45, %v306_v47 }
  0x94   : > { %v311_v54 = vadd.f32 %v310_v50, %v309_v48  ;;  %v314_v55 = vadd.f32 %v313_v51, %v312_v49 }
  0x96   : > { %v316_v56 = vadd.f32 %v315_v52, %v311_v54  ;;  %v319_v57 = vadd.f32 %v318_v53, %v314_v55 }
  0x98   : > { %317 = vst [vmem:[#allocation2] sm:$0xff] %v316_v56  ;;  %320 = vst [vmem:[#allocation3] sm:$0xff] %v319_v57 }
  0x99 PF: > { %s472_s5 = sshll.u32 %s730_s14, 8  ;;  %s343_s8 = sshll.u32 %s903_s22, 4  ;;  %s925_s8 = int_to_ptr.vmem [resolvable:$true] %s343_s8 }
  0x9a   : > { %s922_s7 = scalar_lea.hbm %s982_s2, %s472_s5  ;;  %s929_s18 = scalar_lea.sflag [#allocation6], %s229_s12 }
  0x9b   : > { %s633_s20 = scalar_lea.vmem %s925_s8, 256  ;;  %p993_p13 = scmp.ne.s32.totalorder %s987_s25, 0 }
  0x9c   : > { %p634_p12 = scmp.ne.s32.totalorder %s925_s8, %s633_s20  ;;  %s745_s14 = smov [#allocation9]  }
  0x9d   : > { %s637_s23 = sshll.u32 %s745_s14, 4  ;;  %s638_s23 = int_to_ptr.vmem [resolvable:$false] %s637_s23 }
  0x9e   : > { %p635_p0 = pnand %p634_p12, %p993_p13  ;;  %s639_s30 = scalar_lea.vmem %s638_s23, 512 }
  0x9f   : > { %v324_v58 = vld [vmem:[#allocation2] sm:$0xff]  ;;  %v326_v59 = vld [vmem:[#allocation3] sm:$0xff]  ;;  %p640_p9 = scmp.lt.s32.totalorder %s925_s8, %s638_s23  ;;  %p641_p10 = scmp.lt.s32.totalorder %s639_s30, %s633_s20 }
  0xa0   : > { %325 = vst [vmem:[%s903_s22] sm:$0xff] %v324_v58  ;;  %464 = vst [vmem:[%s903_s22 + $0x8] sm:$0xff] %v326_v59  ;;  %p636_p8 = pneg %p635_p0 }
  0xa1   : > { %p642_p11 = por %p641_p10, %p640_p9 }
  0xa3   : > { %p643_p1 = pnand %p642_p11, %p636_p8 }
  0xa5   : > { %646 = shalt.err (!%p643_p1)
}
  0xa6   : > { %s647_s3 = scalar_lea.hbm %s922_s7, 256  ;;  %s651_s12 = scalar_lea.hbm %s982_s2, 512 }
  0xa7   : > { %p648_p3 = scmp.ne.s32.totalorder %s922_s7, %s647_s3  ;;  %p652_p5 = scmp.lt.s32.totalorder %s922_s7, %s982_s2 }
  0xa8   : > { %p653_p2 = scmp.lt.s32.totalorder %s651_s12, %s647_s3 }
  0xa9   : > { %p649_p7 = pnand %p648_p3, %p993_p13 }
  0xaa   : > { %p654_p4 = por %p653_p2, %p652_p5 }
  0xab   : > { %p650_p6 = pneg %p649_p7 }
  0xad   : > { %p655_p12 = pnand %p654_p4, %p650_p6 }
  0xaf   : > { %658 = shalt.err (!%p655_p12)
}
  0xb0   : > { %s746_s21 = smov 128   ;;  %s747_s27 = smov 8  }
  0xb1   : > { %477 = dma.vmem_to_hbm [thread:$0]  (%p993_p13), %s925_s8, 256, %s922_s7, %s929_s18, %s746_s21, %s746_s21, %s747_s27  }
  0xb2 PF: > { %s358_s5 = sand.u32 1, %s710_s9   ;;  %p994_p0 = scmp.ne.s32.totalorder %s988_s26, 0 }
  0xb3   : > { %p995_p8 = scmp.ge.s32.totalorder %s738_s16, 2  ;;  %s359_s6 = scalar_lea.sflag [#allocation6], %s358_s5 }
  0xb5   : > { %p487_p9 = pnand %p995_p8, %p994_p0 }
  0xb7   : > { %p488_p10 = pneg %p487_p9 }
  0xb9   : > { %704 = dma.done.wait (%p488_p10), %s359_s6, 256  }
  0xba   : > { %706 = vsyncadd (%p488_p10), %s359_s6, 4294967040  ;;  %s21_s16 = sadd.s32 1, %s738_s16   ;;  %s996_s9 = smov %s714_s10 }
  0xbb   : > { %p18_p11 = scmp.ge.s32.totalorder %s21_s16, 4   ;;  %s997_s10 = smov %s718_s11 }
  0xbc   : > { %s998_s11 = smov %s821_s24  ;;  %s999_s12 = smov %s726_s13 }
  0xbd   : > { %s970_s13 = smov 0   ;;  %s1000_s14 = smov %s734_s15 }
  0xbe   : > { %s1001_s15 = smov %s1003_s19  ;;  %20 = sbr.rel (!%p18_p11) target bundleno = 9 (0x9), region = 103 }
  0xc3   :  { %364 = vsyncpa [#allocation5], 1 }
  0xc4   :  { %366 = vsyncpa [#allocation5 + $0x1], 1 }
  0xc5   :  { %367 = vsyncpa [#allocation8], 1 }
  0xc6   :  { %369 = vsyncpa [#allocation8 + $0x1], 1 }
  0xc7   :  { %370 = vsyncpa [#allocation6], 1 }
  0xc8   :  { %372 = vsyncpa [#allocation6 + $0x1], 1 }

</bundles_post_ra>
